<compile_context>
chip_gen: v7x
topology: tpu7x:2x2x1
jax: 0.10.0
libtpu: 0.0.40
codegen_flags: <defaults>
</compile_context>

<pallas_src>
import jax
import jax.numpy as jnp
from jax import lax
from jax.experimental import pallas as pl
from jax.experimental.pallas import tpu as pltpu

FEAT_IN = 8
FEAT_HID = 4
LANES = 128            # vreg lane width
CHUNK = 32             # sublane rows per inner step ([32,128] f32 = 4 vregs/operand)
MAX_BLOCK_ROWS = 1024  # 1024x128 samples/block: x block 4 MiB, out 0.5 MiB
                       # -> ~9 MiB double-buffered (< 16 MiB v5e scoped default)


def _make_kernel(n_chunks: int, unroll: int):
    """Kernel over one [8, block_rows, 128] feature-major x tile."""

    def kernel(w1_ref, b1_ref, w2_ref, b2_ref, x_ref, o_ref):
        # x_ref: [8, block_rows, 128] VMEM (batch dense on sublanes x lanes)
        # o_ref: [block_rows, 128]    VMEM (fully lane-dense output slab)
        # w1 (8,4), b1 (4,), w2 (4,), b2 (1,): SMEM-resident scalars.
        #
        # sigmoid(v) = 0.5 + 0.5*tanh(v/2).  Fold the 1/2 scales (exact powers
        # of two) and the layer-2 constant into scalars once per grid step:
        # no in-loop negates, no reciprocals, no live bias-broadcast vregs.
        a1 = [[0.5 * w1_ref[k, j] for k in range(FEAT_IN)]
              for j in range(FEAT_HID)]                       # 0.5 * W1[:, j]
        c1 = [0.5 * b1_ref[j] for j in range(FEAT_HID)]       # 0.5 * b1[j]
        a2 = [0.25 * w2_ref[j] for j in range(FEAT_HID)]      # 0.25 * w2[j]
        c2 = 0.5 * b2_ref[0]
        for j in range(FEAT_HID):
            c2 = c2 + a2[j]            # 0.5*b2 + 0.25*sum_j w2[j]

        def chunk_body(c, carry):
            r0 = pl.multiple_of(c * CHUNK, CHUNK)
            acc2 = None
            for j in range(FEAT_HID):                  # 4 hidden units
                # Re-load the 8 [CHUNK,128] feature slices per hidden unit
                # (vld slots ~43 cyc/chunk, well under the ~74 cyc VALU bound)
                # to keep register pressure low even with unroll=2.
                acc = a1[j][0] * x_ref[0, pl.ds(r0, CHUNK), :]
                for k in range(1, FEAT_IN):            # 8 inputs: VPU MACs
                    acc = acc + a1[j][k] * x_ref[k, pl.ds(r0, CHUNK), :]
                t = jnp.tanh(acc + c1[j])              # EUP; == 2*sigmoid(h)-1
                acc2 = a2[j] * t if acc2 is None else acc2 + a2[j] * t
            # 0.5 + 0.5*tanh(z/2) == sigmoid(z)
            o_ref[pl.ds(r0, CHUNK), :] = 0.5 + 0.5 * jnp.tanh(acc2 + c2)
            return carry

        # Unroll-by-2: one chunk's EUP tanh overlaps the next chunk's VALU
        # MACs and vector loads (only matters once compute-bound, e.g. v7x).
        lax.fori_loop(0, n_chunks, chunk_body, None, unroll=unroll)

    return kernel


def _mlp_pallas(x_fm, w1, b1, w2, b2):
    """x_fm: [8, R, 128] feature-major f32 -> [R, 128] f32."""
    _, n_rows, _ = x_fm.shape
    block_rows = min(MAX_BLOCK_ROWS, -(-n_rows // CHUNK) * CHUNK)
    n_chunks = block_rows // CHUNK
    unroll = 2 if n_chunks % 2 == 0 else 1
    grid = (pl.cdiv(n_rows, block_rows),)   # ragged last block: Pallas masks it

    return pl.pallas_call(
        _make_kernel(n_chunks, unroll),
        out_shape=jax.ShapeDtypeStruct((n_rows, LANES), jnp.float32),
        grid_spec=pltpu.PrefetchScalarGridSpec(
            num_scalar_prefetch=0,
            grid=grid,
            in_specs=[
                pl.BlockSpec(memory_space=pltpu.MemorySpace.SMEM),  # w1 (8,4)
                pl.BlockSpec(memory_space=pltpu.MemorySpace.SMEM),  # b1 (4,)
                pl.BlockSpec(memory_space=pltpu.MemorySpace.SMEM),  # w2 (4,)
                pl.BlockSpec(memory_space=pltpu.MemorySpace.SMEM),  # b2 (1,)
                pl.BlockSpec((FEAT_IN, block_rows, LANES),
                             lambda i: (0, i, 0)),                  # x tile
            ],
            out_specs=pl.BlockSpec((block_rows, LANES), lambda i: (i, 0)),
        ),
        compiler_params=pltpu.CompilerParams(
            # Batch tiles are independent.  Portable setting; on v7x switch
            # this axis to pltpu.CORE_PARALLEL if xprof shows one idle TC.
            dimension_semantics=("parallel",),
        ),
    )(w1, b1, w2, b2, x_fm)


@jax.jit
def mlp_forward_feature_major(x_fm, w1, b1, w2, b2):
    """Zero-relayout entry: x_fm is feature-major [8, N] -> [N].

    Keep N a multiple of 128 upstream and no data moves outside the kernel at
    all; otherwise only the <=127-sample tail is padded.
    """
    f, n = x_fm.shape
    assert f == FEAT_IN
    n_rows = -(-n // LANES)
    n_pad = n_rows * LANES
    x_fm = x_fm.astype(jnp.float32)
    if n_pad != n:
        x_fm = jnp.pad(x_fm, ((0, 0), (0, n_pad - n)))
    out = _mlp_pallas(x_fm.reshape(FEAT_IN, n_rows, LANES), w1, b1, w2, b2)
    return out.reshape(n_pad)[:n]            # no-op slice when N % 128 == 0


@jax.jit
def mlp_forward(x, w1, b1, w2, b2):
    """PyTorch `net` contract: x [N, 8] f32 -> [N, 1] f32.

    Sample-major input needs exactly one relayout pass to feature-major
    (tail pad + transpose, adjacent so XLA fuses them into a single copy).
    Use `mlp_forward_feature_major` to skip even that.
    # NOTE: storing/feeding x as bf16 would halve this traffic further but
    # breaks the 1e-5 f32 tolerance, so it is intentionally not done here.
    """
    n = x.shape[0]
    n_rows = -(-n // LANES)
    n_pad = n_rows * LANES
    xp = x.astype(jnp.float32)
    if n_pad != n:
        xp = jnp.pad(xp, ((0, n_pad - n), (0, 0)))     # <=127-sample tail only
    x_fm = xp.T.reshape(FEAT_IN, n_rows, LANES)        # the single relayout copy
    out = _mlp_pallas(x_fm, w1, b1, w2, b2)
    return out.reshape(n_pad)[:n].reshape(n, 1)


def init_params(key):
    # Deterministic init mimicking torch.nn.Linear: U(-1/sqrt(fan_in), +).
    # Weights stored pre-transposed as [in, out]; biases as 1-D vectors.
    k1, k2, k3, k4 = jax.random.split(key, 4)
    bound1 = 1.0 / jnp.sqrt(8.0)
    bound2 = 1.0 / jnp.sqrt(4.0)
    w1 = jax.random.uniform(k1, (FEAT_IN, FEAT_HID), jnp.float32, -bound1, bound1)
    b1 = jax.random.uniform(k2, (FEAT_HID,), jnp.float32, -bound1, bound1)
    w2 = jax.random.uniform(k3, (FEAT_HID,), jnp.float32, -bound2, bound2)
    b2 = jax.random.uniform(k4, (1,), jnp.float32, -bound2, bound2)
    return w1, b1, w2, b2


if __name__ == "__main__":
    key = jax.random.PRNGKey(0)
    k_x, k_p = jax.random.split(key)
    w1, b1, w2, b2 = init_params(k_p)

    def reference(x):
        return jax.nn.sigmoid(jax.nn.sigmoid(x @ w1 + b1) @ w2[:, None] + b2)

    # Covers: tiny batch, ragged tail, multi-chunk block (unroll=2), and a
    # multi-block grid whose last block is ragged.
    for n in (8, 300, 5000, 140000):
        x = jax.random.normal(jax.random.fold_in(k_x, n), (n, FEAT_IN),
                              jnp.float32)
        out = jax.block_until_ready(mlp_forward(x, w1, b1, w2, b2))
        ref = reference(x)
        assert out.shape == (n, 1)
        assert jnp.allclose(out, ref, atol=1e-5, rtol=1e-5), f"mismatch at N={n}"

    # Zero-relayout feature-major fast path (N % 128 == 0 -> no copies outside
    # the kernel).
    n = 1024
    x = jax.random.normal(jax.random.fold_in(k_x, 999), (n, FEAT_IN), jnp.float32)
    out_fm = jax.block_until_ready(
        mlp_forward_feature_major(x.T, w1, b1, w2, b2))
    assert out_fm.shape == (n,)
    assert jnp.allclose(out_fm[:, None], reference(x), atol=1e-5, rtol=1e-5)

    print("KERNEL_OK")
</pallas_src>

<mosaic_0001>
module attributes {stable_mosaic.version = 11 : i64} {
  func.func @kernel(%arg0: i32, %arg1: memref<8x4xf32, #tpu.memory_space<smem>>, %arg2: memref<4xf32, #tpu.memory_space<smem>>, %arg3: memref<4xf32, #tpu.memory_space<smem>>, %arg4: memref<1xf32, #tpu.memory_space<smem>>, %arg5: memref<8x32x128xf32, #tpu.memory_space<vmem>>, %arg6: memref<32x128xf32, #tpu.memory_space<vmem>>) attributes {dimension_semantics = [#tpu.dimension_semantics<parallel>], iteration_bounds = array<i64: 1>, scalar_prefetch = 0 : i64, scratch_operands = 0 : i64, tpu.core_type = #tpu.core_type<tc>, window_params = [{transform_indices = @transform_0, window_bounds = array<i64: 8, 4>}, {transform_indices = @transform_1, window_bounds = array<i64: 4>}, {transform_indices = @transform_2, window_bounds = array<i64: 4>}, {transform_indices = @transform_3, window_bounds = array<i64: 1>}, {transform_indices = @transform_4, window_bounds = array<i64: 8, 32, 128>}, {transform_indices = @transform_5, window_bounds = array<i64: 32, 128>}]} {
    %c0 = arith.constant 0 : index
    %c0_0 = arith.constant 0 : index
    %0 = memref.load %arg1[%c0, %c0_0] : memref<8x4xf32, #tpu.memory_space<smem>>
    %cst = arith.constant 5.000000e-01 : f32
    %1 = arith.mulf %cst, %0 : f32
    %c1 = arith.constant 1 : index
    %c0_1 = arith.constant 0 : index
    %2 = memref.load %arg1[%c1, %c0_1] : memref<8x4xf32, #tpu.memory_space<smem>>
    %cst_2 = arith.constant 5.000000e-01 : f32
    %3 = arith.mulf %cst_2, %2 : f32
    %c2 = arith.constant 2 : index
    %c0_3 = arith.constant 0 : index
    %4 = memref.load %arg1[%c2, %c0_3] : memref<8x4xf32, #tpu.memory_space<smem>>
    %cst_4 = arith.constant 5.000000e-01 : f32
    %5 = arith.mulf %cst_4, %4 : f32
    %c3 = arith.constant 3 : index
    %c0_5 = arith.constant 0 : index
    %6 = memref.load %arg1[%c3, %c0_5] : memref<8x4xf32, #tpu.memory_space<smem>>
    %cst_6 = arith.constant 5.000000e-01 : f32
    %7 = arith.mulf %cst_6, %6 : f32
    %c4 = arith.constant 4 : index
    %c0_7 = arith.constant 0 : index
    %8 = memref.load %arg1[%c4, %c0_7] : memref<8x4xf32, #tpu.memory_space<smem>>
    %cst_8 = arith.constant 5.000000e-01 : f32
    %9 = arith.mulf %cst_8, %8 : f32
    %c5 = arith.constant 5 : index
    %c0_9 = arith.constant 0 : index
    %10 = memref.load %arg1[%c5, %c0_9] : memref<8x4xf32, #tpu.memory_space<smem>>
    %cst_10 = arith.constant 5.000000e-01 : f32
    %11 = arith.mulf %cst_10, %10 : f32
    %c6 = arith.constant 6 : index
    %c0_11 = arith.constant 0 : index
    %12 = memref.load %arg1[%c6, %c0_11] : memref<8x4xf32, #tpu.memory_space<smem>>
    %cst_12 = arith.constant 5.000000e-01 : f32
    %13 = arith.mulf %cst_12, %12 : f32
    %c7 = arith.constant 7 : index
    %c0_13 = arith.constant 0 : index
    %14 = memref.load %arg1[%c7, %c0_13] : memref<8x4xf32, #tpu.memory_space<smem>>
    %cst_14 = arith.constant 5.000000e-01 : f32
    %15 = arith.mulf %cst_14, %14 : f32
    %c0_15 = arith.constant 0 : index
    %c1_16 = arith.constant 1 : index
    %16 = memref.load %arg1[%c0_15, %c1_16] : memref<8x4xf32, #tpu.memory_space<smem>>
    %cst_17 = arith.constant 5.000000e-01 : f32
    %17 = arith.mulf %cst_17, %16 : f32
    %c1_18 = arith.constant 1 : index
    %c1_19 = arith.constant 1 : index
    %18 = memref.load %arg1[%c1_18, %c1_19] : memref<8x4xf32, #tpu.memory_space<smem>>
    %cst_20 = arith.constant 5.000000e-01 : f32
    %19 = arith.mulf %cst_20, %18 : f32
    %c2_21 = arith.constant 2 : index
    %c1_22 = arith.constant 1 : index
    %20 = memref.load %arg1[%c2_21, %c1_22] : memref<8x4xf32, #tpu.memory_space<smem>>
    %cst_23 = arith.constant 5.000000e-01 : f32
    %21 = arith.mulf %cst_23, %20 : f32
    %c3_24 = arith.constant 3 : index
    %c1_25 = arith.constant 1 : index
    %22 = memref.load %arg1[%c3_24, %c1_25] : memref<8x4xf32, #tpu.memory_space<smem>>
    %cst_26 = arith.constant 5.000000e-01 : f32
    %23 = arith.mulf %cst_26, %22 : f32
    %c4_27 = arith.constant 4 : index
    %c1_28 = arith.constant 1 : index
    %24 = memref.load %arg1[%c4_27, %c1_28] : memref<8x4xf32, #tpu.memory_space<smem>>
    %cst_29 = arith.constant 5.000000e-01 : f32
    %25 = arith.mulf %cst_29, %24 : f32
    %c5_30 = arith.constant 5 : index
    %c1_31 = arith.constant 1 : index
    %26 = memref.load %arg1[%c5_30, %c1_31] : memref<8x4xf32, #tpu.memory_space<smem>>
    %cst_32 = arith.constant 5.000000e-01 : f32
    %27 = arith.mulf %cst_32, %26 : f32
    %c6_33 = arith.constant 6 : index
    %c1_34 = arith.constant 1 : index
    %28 = memref.load %arg1[%c6_33, %c1_34] : memref<8x4xf32, #tpu.memory_space<smem>>
    %cst_35 = arith.constant 5.000000e-01 : f32
    %29 = arith.mulf %cst_35, %28 : f32
    %c7_36 = arith.constant 7 : index
    %c1_37 = arith.constant 1 : index
    %30 = memref.load %arg1[%c7_36, %c1_37] : memref<8x4xf32, #tpu.memory_space<smem>>
    %cst_38 = arith.constant 5.000000e-01 : f32
    %31 = arith.mulf %cst_38, %30 : f32
    %c0_39 = arith.constant 0 : index
    %c2_40 = arith.constant 2 : index
    %32 = memref.load %arg1[%c0_39, %c2_40] : memref<8x4xf32, #tpu.memory_space<smem>>
    %cst_41 = arith.constant 5.000000e-01 : f32
    %33 = arith.mulf %cst_41, %32 : f32
    %c1_42 = arith.constant 1 : index
    %c2_43 = arith.constant 2 : index
    %34 = memref.load %arg1[%c1_42, %c2_43] : memref<8x4xf32, #tpu.memory_space<smem>>
    %cst_44 = arith.constant 5.000000e-01 : f32
    %35 = arith.mulf %cst_44, %34 : f32
    %c2_45 = arith.constant 2 : index
    %c2_46 = arith.constant 2 : index
    %36 = memref.load %arg1[%c2_45, %c2_46] : memref<8x4xf32, #tpu.memory_space<smem>>
    %cst_47 = arith.constant 5.000000e-01 : f32
    %37 = arith.mulf %cst_47, %36 : f32
    %c3_48 = arith.constant 3 : index
    %c2_49 = arith.constant 2 : index
    %38 = memref.load %arg1[%c3_48, %c2_49] : memref<8x4xf32, #tpu.memory_space<smem>>
    %cst_50 = arith.constant 5.000000e-01 : f32
    %39 = arith.mulf %cst_50, %38 : f32
    %c4_51 = arith.constant 4 : index
    %c2_52 = arith.constant 2 : index
    %40 = memref.load %arg1[%c4_51, %c2_52] : memref<8x4xf32, #tpu.memory_space<smem>>
    %cst_53 = arith.constant 5.000000e-01 : f32
    %41 = arith.mulf %cst_53, %40 : f32
    %c5_54 = arith.constant 5 : index
    %c2_55 = arith.constant 2 : index
    %42 = memref.load %arg1[%c5_54, %c2_55] : memref<8x4xf32, #tpu.memory_space<smem>>
    %cst_56 = arith.constant 5.000000e-01 : f32
    %43 = arith.mulf %cst_56, %42 : f32
    %c6_57 = arith.constant 6 : index
    %c2_58 = arith.constant 2 : index
    %44 = memref.load %arg1[%c6_57, %c2_58] : memref<8x4xf32, #tpu.memory_space<smem>>
    %cst_59 = arith.constant 5.000000e-01 : f32
    %45 = arith.mulf %cst_59, %44 : f32
    %c7_60 = arith.constant 7 : index
    %c2_61 = arith.constant 2 : index
    %46 = memref.load %arg1[%c7_60, %c2_61] : memref<8x4xf32, #tpu.memory_space<smem>>
    %cst_62 = arith.constant 5.000000e-01 : f32
    %47 = arith.mulf %cst_62, %46 : f32
    %c0_63 = arith.constant 0 : index
    %c3_64 = arith.constant 3 : index
    %48 = memref.load %arg1[%c0_63, %c3_64] : memref<8x4xf32, #tpu.memory_space<smem>>
    %cst_65 = arith.constant 5.000000e-01 : f32
    %49 = arith.mulf %cst_65, %48 : f32
    %c1_66 = arith.constant 1 : index
    %c3_67 = arith.constant 3 : index
    %50 = memref.load %arg1[%c1_66, %c3_67] : memref<8x4xf32, #tpu.memory_space<smem>>
    %cst_68 = arith.constant 5.000000e-01 : f32
    %51 = arith.mulf %cst_68, %50 : f32
    %c2_69 = arith.constant 2 : index
    %c3_70 = arith.constant 3 : index
    %52 = memref.load %arg1[%c2_69, %c3_70] : memref<8x4xf32, #tpu.memory_space<smem>>
    %cst_71 = arith.constant 5.000000e-01 : f32
    %53 = arith.mulf %cst_71, %52 : f32
    %c3_72 = arith.constant 3 : index
    %c3_73 = arith.constant 3 : index
    %54 = memref.load %arg1[%c3_72, %c3_73] : memref<8x4xf32, #tpu.memory_space<smem>>
    %cst_74 = arith.constant 5.000000e-01 : f32
    %55 = arith.mulf %cst_74, %54 : f32
    %c4_75 = arith.constant 4 : index
    %c3_76 = arith.constant 3 : index
    %56 = memref.load %arg1[%c4_75, %c3_76] : memref<8x4xf32, #tpu.memory_space<smem>>
    %cst_77 = arith.constant 5.000000e-01 : f32
    %57 = arith.mulf %cst_77, %56 : f32
    %c5_78 = arith.constant 5 : index
    %c3_79 = arith.constant 3 : index
    %58 = memref.load %arg1[%c5_78, %c3_79] : memref<8x4xf32, #tpu.memory_space<smem>>
    %cst_80 = arith.constant 5.000000e-01 : f32
    %59 = arith.mulf %cst_80, %58 : f32
    %c6_81 = arith.constant 6 : index
    %c3_82 = arith.constant 3 : index
    %60 = memref.load %arg1[%c6_81, %c3_82] : memref<8x4xf32, #tpu.memory_space<smem>>
    %cst_83 = arith.constant 5.000000e-01 : f32
    %61 = arith.mulf %cst_83, %60 : f32
    %c7_84 = arith.constant 7 : index
    %c3_85 = arith.constant 3 : index
    %62 = memref.load %arg1[%c7_84, %c3_85] : memref<8x4xf32, #tpu.memory_space<smem>>
    %cst_86 = arith.constant 5.000000e-01 : f32
    %63 = arith.mulf %cst_86, %62 : f32
    %c0_87 = arith.constant 0 : index
    %64 = memref.load %arg2[%c0_87] : memref<4xf32, #tpu.memory_space<smem>>
    %cst_88 = arith.constant 5.000000e-01 : f32
    %65 = arith.mulf %cst_88, %64 : f32
    %c1_89 = arith.constant 1 : index
    %66 = memref.load %arg2[%c1_89] : memref<4xf32, #tpu.memory_space<smem>>
    %cst_90 = arith.constant 5.000000e-01 : f32
    %67 = arith.mulf %cst_90, %66 : f32
    %c2_91 = arith.constant 2 : index
    %68 = memref.load %arg2[%c2_91] : memref<4xf32, #tpu.memory_space<smem>>
    %cst_92 = arith.constant 5.000000e-01 : f32
    %69 = arith.mulf %cst_92, %68 : f32
    %c3_93 = arith.constant 3 : index
    %70 = memref.load %arg2[%c3_93] : memref<4xf32, #tpu.memory_space<smem>>
    %cst_94 = arith.constant 5.000000e-01 : f32
    %71 = arith.mulf %cst_94, %70 : f32
    %c0_95 = arith.constant 0 : index
    %72 = memref.load %arg3[%c0_95] : memref<4xf32, #tpu.memory_space<smem>>
    %cst_96 = arith.constant 2.500000e-01 : f32
    %73 = arith.mulf %cst_96, %72 : f32
    %c1_97 = arith.constant 1 : index
    %74 = memref.load %arg3[%c1_97] : memref<4xf32, #tpu.memory_space<smem>>
    %cst_98 = arith.constant 2.500000e-01 : f32
    %75 = arith.mulf %cst_98, %74 : f32
    %c2_99 = arith.constant 2 : index
    %76 = memref.load %arg3[%c2_99] : memref<4xf32, #tpu.memory_space<smem>>
    %cst_100 = arith.constant 2.500000e-01 : f32
    %77 = arith.mulf %cst_100, %76 : f32
    %c3_101 = arith.constant 3 : index
    %78 = memref.load %arg3[%c3_101] : memref<4xf32, #tpu.memory_space<smem>>
    %cst_102 = arith.constant 2.500000e-01 : f32
    %79 = arith.mulf %cst_102, %78 : f32
    %c0_103 = arith.constant 0 : index
    %80 = memref.load %arg4[%c0_103] : memref<1xf32, #tpu.memory_space<smem>>
    %cst_104 = arith.constant 5.000000e-01 : f32
    %81 = arith.mulf %cst_104, %80 : f32
    %82 = arith.addf %81, %73 : f32
    %83 = arith.addf %82, %75 : f32
    %84 = arith.addf %83, %77 : f32
    %85 = arith.addf %84, %79 : f32
    %c0_i32 = arith.constant 0 : i32
    %c32_i32 = arith.constant 32 : i32
    %86 = arith.muli %c0_i32, %c32_i32 : i32
    %87 = tpu.assume_multiple %86, 32 : i32
    %c0_105 = arith.constant 0 : index
    %88 = arith.index_cast %87 : i32 to index
    %c0_106 = arith.constant 0 : index
    %89 = vector.load %arg5[%c0_105, %88, %c0_106] : memref<8x32x128xf32, #tpu.memory_space<vmem>>, vector<1x32x128xf32>
    %90 = vector.shape_cast %89 : vector<1x32x128xf32> to vector<32x128xf32>
    %91 = vector.broadcast %1 : f32 to vector<32x128xf32>
    %92 = arith.mulf %91, %90 : vector<32x128xf32>
    %c1_107 = arith.constant 1 : index
    %93 = arith.index_cast %87 : i32 to index
    %c0_108 = arith.constant 0 : index
    %94 = vector.load %arg5[%c1_107, %93, %c0_108] : memref<8x32x128xf32, #tpu.memory_space<vmem>>, vector<1x32x128xf32>
    %95 = vector.shape_cast %94 : vector<1x32x128xf32> to vector<32x128xf32>
    %96 = vector.broadcast %3 : f32 to vector<32x128xf32>
    %97 = arith.mulf %96, %95 : vector<32x128xf32>
    %98 = arith.addf %92, %97 : vector<32x128xf32>
    %c2_109 = arith.constant 2 : index
    %99 = arith.index_cast %87 : i32 to index
    %c0_110 = arith.constant 0 : index
    %100 = vector.load %arg5[%c2_109, %99, %c0_110] : memref<8x32x128xf32, #tpu.memory_space<vmem>>, vector<1x32x128xf32>
    %101 = vector.shape_cast %100 : vector<1x32x128xf32> to vector<32x128xf32>
    %102 = vector.broadcast %5 : f32 to vector<32x128xf32>
    %103 = arith.mulf %102, %101 : vector<32x128xf32>
    %104 = arith.addf %98, %103 : vector<32x128xf32>
    %c3_111 = arith.constant 3 : index
    %105 = arith.index_cast %87 : i32 to index
    %c0_112 = arith.constant 0 : index
    %106 = vector.load %arg5[%c3_111, %105, %c0_112] : memref<8x32x128xf32, #tpu.memory_space<vmem>>, vector<1x32x128xf32>
    %107 = vector.shape_cast %106 : vector<1x32x128xf32> to vector<32x128xf32>
    %108 = vector.broadcast %7 : f32 to vector<32x128xf32>
    %109 = arith.mulf %108, %107 : vector<32x128xf32>
    %110 = arith.addf %104, %109 : vector<32x128xf32>
    %c4_113 = arith.constant 4 : index
    %111 = arith.index_cast %87 : i32 to index
    %c0_114 = arith.constant 0 : index
    %112 = vector.load %arg5[%c4_113, %111, %c0_114] : memref<8x32x128xf32, #tpu.memory_space<vmem>>, vector<1x32x128xf32>
    %113 = vector.shape_cast %112 : vector<1x32x128xf32> to vector<32x128xf32>
    %114 = vector.broadcast %9 : f32 to vector<32x128xf32>
    %115 = arith.mulf %114, %113 : vector<32x128xf32>
    %116 = arith.addf %110, %115 : vector<32x128xf32>
    %c5_115 = arith.constant 5 : index
    %117 = arith.index_cast %87 : i32 to index
    %c0_116 = arith.constant 0 : index
    %118 = vector.load %arg5[%c5_115, %117, %c0_116] : memref<8x32x128xf32, #tpu.memory_space<vmem>>, vector<1x32x128xf32>
    %119 = vector.shape_cast %118 : vector<1x32x128xf32> to vector<32x128xf32>
    %120 = vector.broadcast %11 : f32 to vector<32x128xf32>
    %121 = arith.mulf %120, %119 : vector<32x128xf32>
    %122 = arith.addf %116, %121 : vector<32x128xf32>
    %c6_117 = arith.constant 6 : index
    %123 = arith.index_cast %87 : i32 to index
    %c0_118 = arith.constant 0 : index
    %124 = vector.load %arg5[%c6_117, %123, %c0_118] : memref<8x32x128xf32, #tpu.memory_space<vmem>>, vector<1x32x128xf32>
    %125 = vector.shape_cast %124 : vector<1x32x128xf32> to vector<32x128xf32>
    %126 = vector.broadcast %13 : f32 to vector<32x128xf32>
    %127 = arith.mulf %126, %125 : vector<32x128xf32>
    %128 = arith.addf %122, %127 : vector<32x128xf32>
    %c7_119 = arith.constant 7 : index
    %129 = arith.index_cast %87 : i32 to index
    %c0_120 = arith.constant 0 : index
    %130 = vector.load %arg5[%c7_119, %129, %c0_120] : memref<8x32x128xf32, #tpu.memory_space<vmem>>, vector<1x32x128xf32>
    %131 = vector.shape_cast %130 : vector<1x32x128xf32> to vector<32x128xf32>
    %132 = vector.broadcast %15 : f32 to vector<32x128xf32>
    %133 = arith.mulf %132, %131 : vector<32x128xf32>
    %134 = arith.addf %128, %133 : vector<32x128xf32>
    %135 = vector.broadcast %65 : f32 to vector<32x128xf32>
    %136 = arith.addf %134, %135 : vector<32x128xf32>
    %137 = math.tanh %136 : vector<32x128xf32>
    %138 = vector.broadcast %73 : f32 to vector<32x128xf32>
    %139 = arith.mulf %138, %137 : vector<32x128xf32>
    %c0_121 = arith.constant 0 : index
    %140 = arith.index_cast %87 : i32 to index
    %c0_122 = arith.constant 0 : index
    %141 = vector.load %arg5[%c0_121, %140, %c0_122] : memref<8x32x128xf32, #tpu.memory_space<vmem>>, vector<1x32x128xf32>
    %142 = vector.shape_cast %141 : vector<1x32x128xf32> to vector<32x128xf32>
    %143 = vector.broadcast %17 : f32 to vector<32x128xf32>
    %144 = arith.mulf %143, %142 : vector<32x128xf32>
    %c1_123 = arith.constant 1 : index
    %145 = arith.index_cast %87 : i32 to index
    %c0_124 = arith.constant 0 : index
    %146 = vector.load %arg5[%c1_123, %145, %c0_124] : memref<8x32x128xf32, #tpu.memory_space<vmem>>, vector<1x32x128xf32>
    %147 = vector.shape_cast %146 : vector<1x32x128xf32> to vector<32x128xf32>
    %148 = vector.broadcast %19 : f32 to vector<32x128xf32>
    %149 = arith.mulf %148, %147 : vector<32x128xf32>
    %150 = arith.addf %144, %149 : vector<32x128xf32>
    %c2_125 = arith.constant 2 : index
    %151 = arith.index_cast %87 : i32 to index
    %c0_126 = arith.constant 0 : index
    %152 = vector.load %arg5[%c2_125, %151, %c0_126] : memref<8x32x128xf32, #tpu.memory_space<vmem>>, vector<1x32x128xf32>
    %153 = vector.shape_cast %152 : vector<1x32x128xf32> to vector<32x128xf32>
    %154 = vector.broadcast %21 : f32 to vector<32x128xf32>
    %155 = arith.mulf %154, %153 : vector<32x128xf32>
    %156 = arith.addf %150, %155 : vector<32x128xf32>
    %c3_127 = arith.constant 3 : index
    %157 = arith.index_cast %87 : i32 to index
    %c0_128 = arith.constant 0 : index
    %158 = vector.load %arg5[%c3_127, %157, %c0_128] : memref<8x32x128xf32, #tpu.memory_space<vmem>>, vector<1x32x128xf32>
    %159 = vector.shape_cast %158 : vector<1x32x128xf32> to vector<32x128xf32>
    %160 = vector.broadcast %23 : f32 to vector<32x128xf32>
    %161 = arith.mulf %160, %159 : vector<32x128xf32>
    %162 = arith.addf %156, %161 : vector<32x128xf32>
    %c4_129 = arith.constant 4 : index
    %163 = arith.index_cast %87 : i32 to index
    %c0_130 = arith.constant 0 : index
    %164 = vector.load %arg5[%c4_129, %163, %c0_130] : memref<8x32x128xf32, #tpu.memory_space<vmem>>, vector<1x32x128xf32>
    %165 = vector.shape_cast %164 : vector<1x32x128xf32> to vector<32x128xf32>
    %166 = vector.broadcast %25 : f32 to vector<32x128xf32>
    %167 = arith.mulf %166, %165 : vector<32x128xf32>
    %168 = arith.addf %162, %167 : vector<32x128xf32>
    %c5_131 = arith.constant 5 : index
    %169 = arith.index_cast %87 : i32 to index
    %c0_132 = arith.constant 0 : index
    %170 = vector.load %arg5[%c5_131, %169, %c0_132] : memref<8x32x128xf32, #tpu.memory_space<vmem>>, vector<1x32x128xf32>
    %171 = vector.shape_cast %170 : vector<1x32x128xf32> to vector<32x128xf32>
    %172 = vector.broadcast %27 : f32 to vector<32x128xf32>
    %173 = arith.mulf %172, %171 : vector<32x128xf32>
    %174 = arith.addf %168, %173 : vector<32x128xf32>
    %c6_133 = arith.constant 6 : index
    %175 = arith.index_cast %87 : i32 to index
    %c0_134 = arith.constant 0 : index
    %176 = vector.load %arg5[%c6_133, %175, %c0_134] : memref<8x32x128xf32, #tpu.memory_space<vmem>>, vector<1x32x128xf32>
    %177 = vector.shape_cast %176 : vector<1x32x128xf32> to vector<32x128xf32>
    %178 = vector.broadcast %29 : f32 to vector<32x128xf32>
    %179 = arith.mulf %178, %177 : vector<32x128xf32>
    %180 = arith.addf %174, %179 : vector<32x128xf32>
    %c7_135 = arith.constant 7 : index
    %181 = arith.index_cast %87 : i32 to index
    %c0_136 = arith.constant 0 : index
    %182 = vector.load %arg5[%c7_135, %181, %c0_136] : memref<8x32x128xf32, #tpu.memory_space<vmem>>, vector<1x32x128xf32>
    %183 = vector.shape_cast %182 : vector<1x32x128xf32> to vector<32x128xf32>
    %184 = vector.broadcast %31 : f32 to vector<32x128xf32>
    %185 = arith.mulf %184, %183 : vector<32x128xf32>
    %186 = arith.addf %180, %185 : vector<32x128xf32>
    %187 = vector.broadcast %67 : f32 to vector<32x128xf32>
    %188 = arith.addf %186, %187 : vector<32x128xf32>
    %189 = math.tanh %188 : vector<32x128xf32>
    %190 = vector.broadcast %75 : f32 to vector<32x128xf32>
    %191 = arith.mulf %190, %189 : vector<32x128xf32>
    %192 = arith.addf %139, %191 : vector<32x128xf32>
    %c0_137 = arith.constant 0 : index
    %193 = arith.index_cast %87 : i32 to index
    %c0_138 = arith.constant 0 : index
    %194 = vector.load %arg5[%c0_137, %193, %c0_138] : memref<8x32x128xf32, #tpu.memory_space<vmem>>, vector<1x32x128xf32>
    %195 = vector.shape_cast %194 : vector<1x32x128xf32> to vector<32x128xf32>
    %196 = vector.broadcast %33 : f32 to vector<32x128xf32>
    %197 = arith.mulf %196, %195 : vector<32x128xf32>
    %c1_139 = arith.constant 1 : index
    %198 = arith.index_cast %87 : i32 to index
    %c0_140 = arith.constant 0 : index
    %199 = vector.load %arg5[%c1_139, %198, %c0_140] : memref<8x32x128xf32, #tpu.memory_space<vmem>>, vector<1x32x128xf32>
    %200 = vector.shape_cast %199 : vector<1x32x128xf32> to vector<32x128xf32>
    %201 = vector.broadcast %35 : f32 to vector<32x128xf32>
    %202 = arith.mulf %201, %200 : vector<32x128xf32>
    %203 = arith.addf %197, %202 : vector<32x128xf32>
    %c2_141 = arith.constant 2 : index
    %204 = arith.index_cast %87 : i32 to index
    %c0_142 = arith.constant 0 : index
    %205 = vector.load %arg5[%c2_141, %204, %c0_142] : memref<8x32x128xf32, #tpu.memory_space<vmem>>, vector<1x32x128xf32>
    %206 = vector.shape_cast %205 : vector<1x32x128xf32> to vector<32x128xf32>
    %207 = vector.broadcast %37 : f32 to vector<32x128xf32>
    %208 = arith.mulf %207, %206 : vector<32x128xf32>
    %209 = arith.addf %203, %208 : vector<32x128xf32>
    %c3_143 = arith.constant 3 : index
    %210 = arith.index_cast %87 : i32 to index
    %c0_144 = arith.constant 0 : index
    %211 = vector.load %arg5[%c3_143, %210, %c0_144] : memref<8x32x128xf32, #tpu.memory_space<vmem>>, vector<1x32x128xf32>
    %212 = vector.shape_cast %211 : vector<1x32x128xf32> to vector<32x128xf32>
    %213 = vector.broadcast %39 : f32 to vector<32x128xf32>
    %214 = arith.mulf %213, %212 : vector<32x128xf32>
    %215 = arith.addf %209, %214 : vector<32x128xf32>
    %c4_145 = arith.constant 4 : index
    %216 = arith.index_cast %87 : i32 to index
    %c0_146 = arith.constant 0 : index
    %217 = vector.load %arg5[%c4_145, %216, %c0_146] : memref<8x32x128xf32, #tpu.memory_space<vmem>>, vector<1x32x128xf32>
    %218 = vector.shape_cast %217 : vector<1x32x128xf32> to vector<32x128xf32>
    %219 = vector.broadcast %41 : f32 to vector<32x128xf32>
    %220 = arith.mulf %219, %218 : vector<32x128xf32>
    %221 = arith.addf %215, %220 : vector<32x128xf32>
    %c5_147 = arith.constant 5 : index
    %222 = arith.index_cast %87 : i32 to index
    %c0_148 = arith.constant 0 : index
    %223 = vector.load %arg5[%c5_147, %222, %c0_148] : memref<8x32x128xf32, #tpu.memory_space<vmem>>, vector<1x32x128xf32>
    %224 = vector.shape_cast %223 : vector<1x32x128xf32> to vector<32x128xf32>
    %225 = vector.broadcast %43 : f32 to vector<32x128xf32>
    %226 = arith.mulf %225, %224 : vector<32x128xf32>
    %227 = arith.addf %221, %226 : vector<32x128xf32>
    %c6_149 = arith.constant 6 : index
    %228 = arith.index_cast %87 : i32 to index
    %c0_150 = arith.constant 0 : index
    %229 = vector.load %arg5[%c6_149, %228, %c0_150] : memref<8x32x128xf32, #tpu.memory_space<vmem>>, vector<1x32x128xf32>
    %230 = vector.shape_cast %229 : vector<1x32x128xf32> to vector<32x128xf32>
    %231 = vector.broadcast %45 : f32 to vector<32x128xf32>
    %232 = arith.mulf %231, %230 : vector<32x128xf32>
    %233 = arith.addf %227, %232 : vector<32x128xf32>
    %c7_151 = arith.constant 7 : index
    %234 = arith.index_cast %87 : i32 to index
    %c0_152 = arith.constant 0 : index
    %235 = vector.load %arg5[%c7_151, %234, %c0_152] : memref<8x32x128xf32, #tpu.memory_space<vmem>>, vector<1x32x128xf32>
    %236 = vector.shape_cast %235 : vector<1x32x128xf32> to vector<32x128xf32>
    %237 = vector.broadcast %47 : f32 to vector<32x128xf32>
    %238 = arith.mulf %237, %236 : vector<32x128xf32>
    %239 = arith.addf %233, %238 : vector<32x128xf32>
    %240 = vector.broadcast %69 : f32 to vector<32x128xf32>
    %241 = arith.addf %239, %240 : vector<32x128xf32>
    %242 = math.tanh %241 : vector<32x128xf32>
    %243 = vector.broadcast %77 : f32 to vector<32x128xf32>
    %244 = arith.mulf %243, %242 : vector<32x128xf32>
    %245 = arith.addf %192, %244 : vector<32x128xf32>
    %c0_153 = arith.constant 0 : index
    %246 = arith.index_cast %87 : i32 to index
    %c0_154 = arith.constant 0 : index
    %247 = vector.load %arg5[%c0_153, %246, %c0_154] : memref<8x32x128xf32, #tpu.memory_space<vmem>>, vector<1x32x128xf32>
    %248 = vector.shape_cast %247 : vector<1x32x128xf32> to vector<32x128xf32>
    %249 = vector.broadcast %49 : f32 to vector<32x128xf32>
    %250 = arith.mulf %249, %248 : vector<32x128xf32>
    %c1_155 = arith.constant 1 : index
    %251 = arith.index_cast %87 : i32 to index
    %c0_156 = arith.constant 0 : index
    %252 = vector.load %arg5[%c1_155, %251, %c0_156] : memref<8x32x128xf32, #tpu.memory_space<vmem>>, vector<1x32x128xf32>
    %253 = vector.shape_cast %252 : vector<1x32x128xf32> to vector<32x128xf32>
    %254 = vector.broadcast %51 : f32 to vector<32x128xf32>
    %255 = arith.mulf %254, %253 : vector<32x128xf32>
    %256 = arith.addf %250, %255 : vector<32x128xf32>
    %c2_157 = arith.constant 2 : index
    %257 = arith.index_cast %87 : i32 to index
    %c0_158 = arith.constant 0 : index
    %258 = vector.load %arg5[%c2_157, %257, %c0_158] : memref<8x32x128xf32, #tpu.memory_space<vmem>>, vector<1x32x128xf32>
    %259 = vector.shape_cast %258 : vector<1x32x128xf32> to vector<32x128xf32>
    %260 = vector.broadcast %53 : f32 to vector<32x128xf32>
    %261 = arith.mulf %260, %259 : vector<32x128xf32>
    %262 = arith.addf %256, %261 : vector<32x128xf32>
    %c3_159 = arith.constant 3 : index
    %263 = arith.index_cast %87 : i32 to index
    %c0_160 = arith.constant 0 : index
    %264 = vector.load %arg5[%c3_159, %263, %c0_160] : memref<8x32x128xf32, #tpu.memory_space<vmem>>, vector<1x32x128xf32>
    %265 = vector.shape_cast %264 : vector<1x32x128xf32> to vector<32x128xf32>
    %266 = vector.broadcast %55 : f32 to vector<32x128xf32>
    %267 = arith.mulf %266, %265 : vector<32x128xf32>
    %268 = arith.addf %262, %267 : vector<32x128xf32>
    %c4_161 = arith.constant 4 : index
    %269 = arith.index_cast %87 : i32 to index
    %c0_162 = arith.constant 0 : index
    %270 = vector.load %arg5[%c4_161, %269, %c0_162] : memref<8x32x128xf32, #tpu.memory_space<vmem>>, vector<1x32x128xf32>
    %271 = vector.shape_cast %270 : vector<1x32x128xf32> to vector<32x128xf32>
    %272 = vector.broadcast %57 : f32 to vector<32x128xf32>
    %273 = arith.mulf %272, %271 : vector<32x128xf32>
    %274 = arith.addf %268, %273 : vector<32x128xf32>
    %c5_163 = arith.constant 5 : index
    %275 = arith.index_cast %87 : i32 to index
    %c0_164 = arith.constant 0 : index
    %276 = vector.load %arg5[%c5_163, %275, %c0_164] : memref<8x32x128xf32, #tpu.memory_space<vmem>>, vector<1x32x128xf32>
    %277 = vector.shape_cast %276 : vector<1x32x128xf32> to vector<32x128xf32>
    %278 = vector.broadcast %59 : f32 to vector<32x128xf32>
    %279 = arith.mulf %278, %277 : vector<32x128xf32>
    %280 = arith.addf %274, %279 : vector<32x128xf32>
    %c6_165 = arith.constant 6 : index
    %281 = arith.index_cast %87 : i32 to index
    %c0_166 = arith.constant 0 : index
    %282 = vector.load %arg5[%c6_165, %281, %c0_166] : memref<8x32x128xf32, #tpu.memory_space<vmem>>, vector<1x32x128xf32>
    %283 = vector.shape_cast %282 : vector<1x32x128xf32> to vector<32x128xf32>
    %284 = vector.broadcast %61 : f32 to vector<32x128xf32>
    %285 = arith.mulf %284, %283 : vector<32x128xf32>
    %286 = arith.addf %280, %285 : vector<32x128xf32>
    %c7_167 = arith.constant 7 : index
    %287 = arith.index_cast %87 : i32 to index
    %c0_168 = arith.constant 0 : index
    %288 = vector.load %arg5[%c7_167, %287, %c0_168] : memref<8x32x128xf32, #tpu.memory_space<vmem>>, vector<1x32x128xf32>
    %289 = vector.shape_cast %288 : vector<1x32x128xf32> to vector<32x128xf32>
    %290 = vector.broadcast %63 : f32 to vector<32x128xf32>
    %291 = arith.mulf %290, %289 : vector<32x128xf32>
    %292 = arith.addf %286, %291 : vector<32x128xf32>
    %293 = vector.broadcast %71 : f32 to vector<32x128xf32>
    %294 = arith.addf %292, %293 : vector<32x128xf32>
    %295 = math.tanh %294 : vector<32x128xf32>
    %296 = vector.broadcast %79 : f32 to vector<32x128xf32>
    %297 = arith.mulf %296, %295 : vector<32x128xf32>
    %298 = arith.addf %245, %297 : vector<32x128xf32>
    %299 = vector.broadcast %85 : f32 to vector<32x128xf32>
    %300 = arith.addf %298, %299 : vector<32x128xf32>
    %301 = math.tanh %300 : vector<32x128xf32>
    %cst_169 = arith.constant 5.000000e-01 : f32
    %302 = vector.broadcast %cst_169 : f32 to vector<32x128xf32>
    %303 = arith.mulf %302, %301 : vector<32x128xf32>
    %cst_170 = arith.constant 5.000000e-01 : f32
    %304 = vector.broadcast %cst_170 : f32 to vector<32x128xf32>
    %305 = arith.addf %304, %303 : vector<32x128xf32>
    %306 = arith.index_cast %87 : i32 to index
    %c0_171 = arith.constant 0 : index
    %307 = vector.load %arg6[%306, %c0_171] : memref<32x128xf32, #tpu.memory_space<vmem>>, vector<32x128xf32>
    tpu.vector_store %arg6[%306, %c0_171], %305 {strides = array<i32>} : memref<32x128xf32, #tpu.memory_space<vmem>>, vector<32x128xf32>,
    %c1_i32 = arith.constant 1 : i32
    return
  }
  func.func @transform_0(%arg0: i32) -> (i32, i32) {
    %c0_i32 = arith.constant 0 : i32
    %c0_i32_0 = arith.constant 0 : i32
    %c0_i32_1 = arith.constant 0 : i32
    return %c0_i32, %c0_i32_0 : i32, i32
  }
  func.func @transform_1(%arg0: i32) -> i32 {
    %c0_i32 = arith.constant 0 : i32
    %c0_i32_0 = arith.constant 0 : i32
    return %c0_i32 : i32
  }
  func.func @transform_2(%arg0: i32) -> i32 {
    %c0_i32 = arith.constant 0 : i32
    %c0_i32_0 = arith.constant 0 : i32
    return %c0_i32 : i32
  }
  func.func @transform_3(%arg0: i32) -> i32 {
    %c0_i32 = arith.constant 0 : i32
    %c0_i32_0 = arith.constant 0 : i32
    return %c0_i32 : i32
  }
  func.func @transform_4(%arg0: i32) -> (i32, i32, i32) {
    %c0_i32 = arith.constant 0 : i32
    %c0_i32_0 = arith.constant 0 : i32
    %c0_i32_1 = arith.constant 0 : i32
    return %c0_i32, %arg0, %c0_i32_0 : i32, i32, i32
  }
  func.func @transform_5(%arg0: i32) -> (i32, i32) {
    %c0_i32 = arith.constant 0 : i32
    %c0_i32_0 = arith.constant 0 : i32
    return %arg0, %c0_i32 : i32, i32
  }
}

</mosaic_0001>

<bundles_post_ra>
// kernel: mlp_forward.1
= control target key start
LH: loop header
LB: loop body
LE: loop exit
PB: predicated region body
PF: predicated region fallthrough
CT: control target
= control target key end

     0   :  { %11 = vsyncpa [#allocation4], 0  ;;  %s1207_s0 = inlined_call_operand.vmem [shape: f32[8,4], index: 0, kind: input, shape index: {}]   ;;  %s1208_s1 = inlined_call_operand.vmem [shape: f32[4], index: 1, kind: input, shape index: {}]   ;;  %s1209_s2 = inlined_call_operand.vmem [shape: f32[4], index: 2, kind: input, shape index: {}]   ;;  %s1210_s3 = inlined_call_operand.<no memory space> [shape: f32[1], index: 3, kind: input, shape index: {}]   ;;  %s1211_s4 = inlined_call_operand.vmem [shape: f32[8,1,128], index: 4, kind: input, shape index: {}]   ;;  %s1212_s5 = inlined_call_operand.vmem [shape: f32[1,128], index: 5, kind: output, shape index: {}]  }
   0x1   :  { %12 = vsyncpa [#allocation6], 0  ;;  %s29_s20 = sshll.u32 %s1208_s1, 4  ;;  %v62_v0 = vld [vmem:[%s1211_s4] sm:$0x1]  ;;  %s19_s25 = sshll.u32 %s1207_s0, 4  ;;  %s30_s20 = int_to_ptr.vmem [resolvable:$true] %s29_s20  ;;  %s20_s25 = int_to_ptr.vmem [resolvable:$true] %s19_s25 }
   0x2   :  { %63 = vst [vmem:[#allocation8] sm:$0x1] %v62_v0  ;;  %v64_v1 = vld [vmem:[%s1211_s4 + $0x1] sm:$0x1]  ;;  %v66_v2 = vld [vmem:[%s1211_s4 + $0x2] sm:$0x1]  ;;  %p756_p1 = scmp.lt.s32.totalorder %s30_s20, %s30_s20 }
   0x3   :  { %s751_s30 = scalar_lea.vmem %s30_s20, 16 }
   0x4   :  { %p752_p0 = scmp.ne.s32.totalorder %s30_s20, %s751_s30  ;;  %p757_p2 = scmp.lt.s32.totalorder %s751_s30, %s751_s30 }
   0x6   :  { %p758_p3 = por %p757_p2, %p756_p1 }
   0x8   :  { %p759_p4 = pnand %p758_p3, %p752_p0 }
   0xa   :  { %762 = shalt.err (!%p759_p4)
}
   0xb   :  { %s791_s1 = smov [#allocation5]   ;;  %65 = vst [vmem:[#allocation8 + $0x20] sm:$0x1] %v64_v1  ;;  %67 = vst [vmem:[#allocation8 + $0x40] sm:$0x1] %v66_v2  ;;  %s763_s13 = scalar_lea.vmem %s20_s25, 128 }
   0xc   :  { %32 = dma.vmem_to_smem %s30_s20, 16, %s791_s1, [#allocation6]   ;;  %v68_v3 = vld [vmem:[%s1211_s4 + $0x3] sm:$0x1]  ;;  %v70_v4 = vld [vmem:[%s1211_s4 + $0x4] sm:$0x1] }
   0xd   :  { %69 = vst [vmem:[#allocation8 + $0x60] sm:$0x1] %v68_v3  ;;  %71 = vst [vmem:[#allocation8 + $0x80] sm:$0x1] %v70_v4  ;;  %v72_v5 = vld [vmem:[%s1211_s4 + $0x5] sm:$0x1]  ;;  %p764_p5 = scmp.ne.s32.totalorder %s20_s25, %s763_s13  ;;  %p768_p6 = scmp.lt.s32.totalorder %s20_s25, %s20_s25 }
   0xe   :  { %v74_v6 = vld [vmem:[%s1211_s4 + $0x6] sm:$0x1]  ;;  %p769_p7 = scmp.lt.s32.totalorder %s763_s13, %s763_s13 }
  0x10   :  { %p770_p8 = por %p769_p7, %p768_p6 }
  0x12   :  { %p771_p9 = pnand %p770_p8, %p764_p5 }
  0x14   :  { %774 = shalt.err (!%p771_p9)
}
  0x15   :  { %s792_s14 = smov [#allocation3]   ;;  %73 = vst [vmem:[#allocation8 + $0xa0] sm:$0x1] %v72_v5  ;;  %75 = vst [vmem:[#allocation8 + $0xc0] sm:$0x1] %v74_v6  ;;  %s39_s19 = sshll.u32 %s1209_s2, 4  ;;  %s40_s19 = int_to_ptr.vmem [resolvable:$true] %s39_s19 }
  0x16   :  { %22 = dma.vmem_to_smem %s20_s25, 128, %s792_s14, [#allocation4]   ;;  %v76_v7 = vld [vmem:[%s1211_s4 + $0x7] sm:$0x1] }
  0x17   :  { %77 = vst [vmem:[#allocation8 + $0xe0] sm:$0x1] %v76_v7  ;;  %s775_s20 = scalar_lea.vmem %s40_s19, 16  ;;  %p780_p11 = scmp.lt.s32.totalorder %s40_s19, %s40_s19 }
  0x18   :  { %p776_p10 = scmp.ne.s32.totalorder %s40_s19, %s775_s20  ;;  %p781_p12 = scmp.lt.s32.totalorder %s775_s20, %s775_s20 }
  0x1a   :  { %p782_p13 = por %p781_p12, %p780_p11 }
  0x1c   :  { %p783_p0 = pnand %p782_p13, %p776_p10 }
  0x1e   :  { %786 = shalt.err (!%p783_p0)
}
  0x1f   :  { %s793_s21 = smov [#allocation7]  }
  0x20   :  { %42 = dma.vmem_to_smem %s40_s19, 16, %s793_s21, [#allocation6]  }
  0x21   :  { %787 = dma.done.wait [#allocation4], 128  }
  0x22   :  { %788 = vsyncadd [#allocation4], 4294967168 }
  0x23   :  { %789 = dma.done.wait [#allocation6], 32  }
  0x24   :  { %790 = vsyncadd [#allocation6], 4294967264 }
  0x25   :  { %125 = sfence }
  0x26   :  { %s126_s4 = sld [smem:[#allocation3]]  ;;  %v863_v8 = vld [vmem:[#allocation8] sm:$0xff]  ;;  %v865_v9 = vld [vmem:[#allocation8 + $0x8] sm:$0xff]  ;;  %v867_v10 = vld [vmem:[#allocation8 + $0x10] sm:$0xff]  ;;  %s896_s6 = sld [smem:[#allocation3 + $0x1]] }
  0x27   :  { %s671_s22 = sld [smem:[#allocation3 + $0x80]]  ;;  %v869_v11 = vld [vmem:[#allocation8 + $0x18] sm:$0xff]  ;;  %v871_v12 = vld [vmem:[#allocation8 + $0x20] sm:$0xff]  ;;  %v873_v13 = vld [vmem:[#allocation8 + $0x28] sm:$0xff]  ;;  %s902_s7 = sld [smem:[#allocation3 + $0x81]] }
  0x28   :  { %s672_s23 = sld [smem:[#allocation3 + $0x100]]  ;;  %v877_v15 = vld [vmem:[#allocation8 + $0x30] sm:$0xff]  ;;  %v879_v16 = vld [vmem:[#allocation8 + $0x38] sm:$0xff]  ;;  %v881_v17 = vld [vmem:[#allocation8 + $0x40] sm:$0xff]  ;;  %s910_s8 = sld [smem:[#allocation3 + $0x101]] }
  0x29   :  { %s857_s2 = sld [smem:[#allocation3 + $0x180]]  ;;  %v888_v22 = vld [vmem:[#allocation8 + $0x48] sm:$0xff]  ;;  %v890_v23 = vld [vmem:[#allocation8 + $0x50] sm:$0xff]  ;;  %v892_v24 = vld [vmem:[#allocation8 + $0x58] sm:$0xff]  ;;  %s937_s11 = sld [smem:[#allocation3 + $0x181]] }
  0x2a   :  { %s859_s24 = sld [smem:[#allocation3 + $0x200]]  ;;  %1222 = vst [vmem:[#allocation12_spill] sm:$0xff] %v892_v24  ;;  %v908_v35 = vld [vmem:[#allocation8 + $0x60] sm:$0xff]  ;;  %v912_v40 = vld [vmem:[#allocation8 + $0x68] sm:$0xff]  ;;  %v914_v41 = vld [vmem:[#allocation8 + $0x70] sm:$0xff]  ;;  %s941_s12 = sld [smem:[#allocation3 + $0x201]] }
  0x2b   :  { %s861_s25 = sld [smem:[#allocation3 + $0x280]]  ;;  %1223 = vst [vmem:[#allocation13_spill] sm:$0xff] %v908_v35  ;;  %1224 = vst [vmem:[#allocation14_spill] sm:$0xff] %v914_v41  ;;  %v916_v42 = vld [vmem:[#allocation8 + $0x78] sm:$0xff]  ;;  %v920_v44 = vld [vmem:[#allocation8 + $0x80] sm:$0xff]  ;;  %s947_s14 = sld [smem:[#allocation3 + $0x281]] }
  0x2c   :  { %s127_s26 = smul.f32 0.5, %s126_s4  ;;  %s875_s29 = sld [smem:[#allocation3 + $0x300]]  ;;  %1225 = vst [vmem:[#allocation15_spill] sm:$0xff] %v920_v44  ;;  %v922_v45 = vld [vmem:[#allocation8 + $0x88] sm:$0xff]  ;;  %v926_v52 = vld [vmem:[#allocation8 + $0x90] sm:$0xff]  ;;  %v933_v57 = vld [vmem:[#allocation8 + $0x98] sm:$0xff] }
  0x2d   :  { %s129_s27 = smul.f32 0.5, %s671_s22  ;;  %1226 = vst [vmem:[#allocation16_spill] sm:$0xff] %v922_v45  ;;  %s924_s9 = sld [smem:[#allocation3 + $0x380]]  ;;  %1227 = vst [vmem:[#allocation17_spill] sm:$0xff] %v926_v52  ;;  %v935_v58 = vld [vmem:[#allocation8 + $0xa0] sm:$0xff]  ;;  %v944_v1 = vld [vmem:[#allocation8 + $0xa8] sm:$0xff] }
  0x2e   :  { %s131_s28 = smul.f32 0.5, %s672_s23  ;;  %v216_v14 = vstv %s127_s26  ;;  %v950_v4 = vld [vmem:[#allocation8 + $0xb0] sm:$0xff]  ;;  %v952_v5 = vld [vmem:[#allocation8 + $0xb8] sm:$0xff]  ;;  %s973_s19 = sld [smem:[#allocation3 + $0x301]] }
  0x2f   :  { %s133_s30 = smul.f32 0.5, %s857_s2  ;;  %v217_v18 = vmul.f32 %v216_v14, %v863_v8  ;;  %v218_v19 = vmul.f32 %v216_v14, %v865_v9  ;;  %v219_v20 = vmul.f32 %v216_v14, %v867_v10  ;;  %v220_v21 = vmul.f32 %v216_v14, %v869_v11  ;;  %v956_v14 = vld [vmem:[#allocation8 + $0xc0] sm:$0xff]  ;;  %s992_s4 = sld [smem:[#allocation5]] }
  0x30   :  { %s135_s1 = smul.f32 0.5, %s859_s24  ;;  %v227_v25 = vstv %s129_s27  ;;  %v242_v26 = vstv %s131_s28  ;;  %s994_s22 = sld [smem:[#allocation3 + $0x2]] }
  0x31   :  { %s137_s0 = smul.f32 0.5, %s861_s25  ;;  %v228_v27 = vmul.f32 %v227_v25, %v871_v12  ;;  %v229_v28 = vmul.f32 %v227_v25, %v873_v13  ;;  %v230_v29 = vmul.f32 %v227_v25, %v877_v15  ;;  %v231_v30 = vmul.f32 %v227_v25, %v879_v16  ;;  %v962_v25 = vld [vmem:[#allocation8 + $0xd0] sm:$0xff]  ;;  %s999_s23 = sld [smem:[#allocation3 + $0x381]] }
  0x32   :  { %v243_v31 = vmul.f32 %v242_v26, %v881_v17  ;;  %v244_v32 = vmul.f32 %v242_v26, %v888_v22  ;;  %v245_v33 = vmul.f32 %v242_v26, %v890_v23  ;;  %v246_v34 = vmul.f32 %v242_v26, %v892_v24  ;;  %s139_s10 = smul.f32 0.5, %s875_s29  ;;  %s1002_s24 = sld [smem:[#allocation3 + $0x82]] }
  0x33   :  { %v232_v36 = vadd.f32 %v228_v27, %v217_v18  ;;  %v233_v37 = vadd.f32 %v229_v28, %v218_v19  ;;  %v234_v38 = vadd.f32 %v230_v29, %v219_v20  ;;  %v235_v39 = vadd.f32 %v231_v30, %v220_v21  ;;  %s143_s13 = smul.f32 0.5, %s896_s6  ;;  %v960_v21 = vld [vmem:[#allocation8 + $0xc8] sm:$0xff]  ;;  %v966_v29 = vld [vmem:[#allocation8 + $0xd8] sm:$0xff]  ;;  %s1019_s25 = sld [smem:[#allocation3 + $0x102]] }
  0x34   :  { %v257_v43 = vstv %s133_s30  ;;  %v272_v46 = vstv %s135_s1  ;;  %v287_v47 = vstv %s137_s0  ;;  %s145_s15 = smul.f32 0.5, %s902_s7  ;;  %v302_v18 = vstv %s139_s10  ;;  %s1023_s26 = sld [smem:[#allocation3 + $0x182]] }
  0x35   :  { %v247_v48 = vadd.f32 %v243_v31, %v232_v36  ;;  %v248_v49 = vadd.f32 %v244_v32, %v233_v37  ;;  %v249_v50 = vadd.f32 %v245_v33, %v234_v38  ;;  %v250_v51 = vadd.f32 %v246_v34, %v235_v39  ;;  %s147_s16 = smul.f32 0.5, %s910_s8  ;;  %s1032_s30 = sld [smem:[#allocation5 + $0x1]] }
  0x36   :  { %v258_v53 = vmul.f32 %v257_v43, %v908_v35  ;;  %v259_v54 = vmul.f32 %v257_v43, %v912_v40  ;;  %v260_v55 = vmul.f32 %v257_v43, %v914_v41  ;;  %v261_v56 = vmul.f32 %v257_v43, %v916_v42  ;;  %s141_s17 = smul.f32 0.5, %s924_s9  ;;  %s1039_s0 = sld [smem:[#allocation3 + $0x202]] }
  0x37   :  { %v273_v59 = vmul.f32 %v272_v46, %v920_v44  ;;  %v274_v60 = vmul.f32 %v272_v46, %v922_v45  ;;  %v275_v0 = vmul.f32 %v272_v46, %v926_v52  ;;  %v276_v3 = vmul.f32 %v272_v46, %v933_v57  ;;  %s149_s18 = smul.f32 0.5, %s937_s11  ;;  %s1042_s7 = sld [smem:[#allocation3 + $0x282]] }
  0x38   :  { %v262_v61 = vadd.f32 %v258_v53, %v247_v48  ;;  %v263_v62 = vadd.f32 %v259_v54, %v248_v49  ;;  %v264_v63 = vadd.f32 %v260_v55, %v249_v50  ;;  %v265_v2 = vadd.f32 %v261_v56, %v250_v51  ;;  %s151_s20 = smul.f32 0.5, %s941_s12  ;;  %v982_v55 = vld [vmem:[#allocation8 + $0xe0] sm:$0xff]  ;;  %s1049_s9 = sld [smem:[#allocation3 + $0x302]] }
  0x39   :  { %v288_v6 = vmul.f32 %v287_v47, %v935_v58  ;;  %v289_v20 = vmul.f32 %v287_v47, %v944_v1  ;;  %v290_v27 = vmul.f32 %v287_v47, %v950_v4  ;;  %v291_v28 = vmul.f32 %v287_v47, %v952_v5  ;;  %s153_s21 = smul.f32 0.5, %s947_s14 }
  0x3a   :  { %v277_v7 = vadd.f32 %v273_v59, %v262_v61  ;;  %v278_v19 = vadd.f32 %v274_v60, %v263_v62  ;;  %v279_v26 = vadd.f32 %v275_v0, %v264_v63  ;;  %v280_v30 = vadd.f32 %v276_v3, %v265_v2  ;;  %s155_s2 = smul.f32 0.5, %s973_s19 }
  0x3b   :  { %v303_v32 = vmul.f32 %v302_v18, %v956_v14  ;;  %v340_v33 = vstv %s143_s13  ;;  %v304_v34 = vmul.f32 %v302_v18, %v960_v21  ;;  %v305_v36 = vmul.f32 %v302_v18, %v962_v25  ;;  %s191_s27 = smul.f32 0.5, %s992_s4  ;;  %s1071_s13 = sld [smem:[#allocation3 + $0x382]] }
  0x3c   :  { %v292_v31 = vadd.f32 %v288_v6, %v277_v7  ;;  %v293_v37 = vadd.f32 %v289_v20, %v278_v19  ;;  %v306_v38 = vmul.f32 %v302_v18, %v966_v29  ;;  %v345_v39 = vstv %s145_s15  ;;  %s159_s28 = smul.f32 0.5, %s994_s22  ;;  %s1078_s15 = sld [smem:[#allocation3 + $0x3]] }
  0x3d   :  { %v354_v43 = vstv %s147_s16  ;;  %v341_v46 = vmul.f32 %v340_v33, %v863_v8  ;;  %v342_v47 = vmul.f32 %v340_v33, %v865_v9  ;;  %v343_v48 = vmul.f32 %v340_v33, %v867_v10  ;;  %s157_s29 = smul.f32 0.5, %s999_s23  ;;  %s1083_s16 = sld [smem:[#allocation3 + $0x83]] }
  0x3e   :  { %v344_v49 = vmul.f32 %v340_v33, %v869_v11  ;;  %v294_v50 = vadd.f32 %v290_v27, %v279_v26  ;;  %v295_v51 = vadd.f32 %v291_v28, %v280_v30  ;;  %v307_v53 = vadd.f32 %v303_v32, %v292_v31  ;;  %v1004_v33 = vld [vmem:[#allocation8 + $0xe8] sm:$0xff]  ;;  %s161_s1 = smul.f32 0.5, %s1002_s24  ;;  %s1105_s4 = sld [smem:[#allocation3 + $0x203]] }
  0x3f   :  { %v317_v54 = vstv %s141_s17  ;;  %v346_v56 = vmul.f32 %v345_v39, %v871_v12  ;;  %v347_v59 = vmul.f32 %v345_v39, %v873_v13  ;;  %v348_v60 = vmul.f32 %v345_v39, %v877_v15  ;;  %s163_s6 = smul.f32 0.5, %s1019_s25  ;;  %s1087_s17 = sld [smem:[#allocation3 + $0x103]] }
  0x40   :  { %v349_v61 = vmul.f32 %v345_v39, %v879_v16  ;;  %v355_v62 = vmul.f32 %v354_v43, %v881_v17  ;;  %v356_v63 = vmul.f32 %v354_v43, %v888_v22  ;;  %v357_v0 = vmul.f32 %v354_v43, %v890_v23  ;;  %s165_s8 = smul.f32 0.5, %s1023_s26  ;;  %s1108_s22 = sld [smem:[#allocation3 + $0x283]] }
  0x41   :  { %v358_v2 = vmul.f32 %v354_v43, %v892_v24  ;;  %v350_v3 = vadd.f32 %v346_v56, %v341_v46  ;;  %v351_v6 = vadd.f32 %v347_v59, %v342_v47  ;;  %v352_v7 = vadd.f32 %v348_v60, %v343_v48  ;;  %v1010_v48 = vld [vmem:[#allocation8 + $0xf0] sm:$0xff]  ;;  %s193_s10 = smul.f32 0.5, %s1032_s30  ;;  %s1124_s26 = sld [smem:[#allocation3 + $0x303]] }
  0x42   :  { %v353_v18 = vadd.f32 %v349_v61, %v344_v49  ;;  %v318_v19 = vmul.f32 %v317_v54, %v982_v55  ;;  %v363_v20 = vstv %s149_s18  ;;  %v372_v26 = vstv %s151_s20  ;;  %v1012_v49 = vld [vmem:[#allocation8 + $0xf8] sm:$0xff]  ;;  %s167_s11 = smul.f32 0.5, %s1039_s0  ;;  %s1091_s18 = sld [smem:[#allocation5 + $0x2]] }
  0x43   :  { %v381_v27 = vstv %s153_s21  ;;  %v359_v28 = vadd.f32 %v355_v62, %v350_v3  ;;  %v360_v30 = vadd.f32 %v356_v63, %v351_v6  ;;  %v361_v31 = vadd.f32 %v357_v0, %v352_v7  ;;  %s169_s12 = smul.f32 0.5, %s1042_s7  ;;  %s1100_s20 = sld [smem:[#allocation3 + $0x183]] }
  0x44   :  { %v362_v32 = vadd.f32 %v358_v2, %v353_v18  ;;  %v364_v39 = vmul.f32 %v363_v20, %v908_v35  ;;  %v365_v43 = vmul.f32 %v363_v20, %v912_v40  ;;  %v366_v46 = vmul.f32 %v363_v20, %v914_v41  ;;  %s171_s14 = smul.f32 0.5, %s1049_s9  ;;  %s1145_s30 = sld [smem:[#allocation5 + $0x3]] }
  0x45   :  { %v367_v47 = vmul.f32 %v363_v20, %v916_v42  ;;  %v373_v56 = vmul.f32 %v372_v26, %v920_v44  ;;  %v374_v59 = vmul.f32 %v372_v26, %v922_v45  ;;  %v375_v60 = vmul.f32 %v372_v26, %v926_v52  ;;  %s173_s19 = smul.f32 0.5, %s1071_s13  ;;  %s1177_s9 = sld [smem:[#allocation7 + $0x2]] }
  0x46   :  { %v376_v61 = vmul.f32 %v372_v26, %v933_v57  ;;  %v368_v62 = vadd.f32 %v364_v39, %v359_v28  ;;  %v369_v63 = vadd.f32 %v365_v43, %v360_v30  ;;  %v370_v0 = vadd.f32 %v366_v46, %v361_v31  ;;  %s175_s21 = smul.f32 0.5, %s1078_s15 }
  0x47   :  { %v371_v2 = vadd.f32 %v367_v47, %v362_v32  ;;  %v308_v3 = vadd.f32 %v304_v34, %v293_v37  ;;  %v309_v6 = vadd.f32 %v305_v36, %v294_v50  ;;  %v310_v7 = vadd.f32 %v306_v38, %v295_v51  ;;  %s177_s23 = smul.f32 0.5, %s1083_s16 }
  0x48   :  { %v319_v18 = vmul.f32 %v317_v54, %v1004_v33  ;;  %v320_v20 = vmul.f32 %v317_v54, %v1010_v48  ;;  %v321_v52 = vmul.f32 %v317_v54, %v1012_v49  ;;  %v322_v45 = vadd.f32 %v318_v19, %v307_v53  ;;  %s195_s24 = smul.f32 0.5, %s1091_s18 }
  0x49   :  { %v390_v44 = vstv %s155_s2  ;;  %v377_v26 = vadd.f32 %v373_v56, %v368_v62  ;;  %v378_v28 = vadd.f32 %v374_v59, %v369_v63  ;;  %v382_v34 = vmul.f32 %v381_v27, %v935_v58  ;;  %s179_s2 = smul.f32 0.5, %s1087_s17 }
  0x4a   :  { %v383_v36 = vmul.f32 %v381_v27, %v944_v1  ;;  %v379_v37 = vadd.f32 %v375_v60, %v370_v0  ;;  %v380_v38 = vadd.f32 %v376_v61, %v371_v2  ;;  %v384_v50 = vmul.f32 %v381_v27, %v950_v4  ;;  %s181_s25 = smul.f32 0.5, %s1100_s20 }
  0x4b   :  { %v385_v51 = vmul.f32 %v381_v27, %v952_v5  ;;  %v323_v53 = vadd.f32 %v319_v18, %v308_v3  ;;  %v326_v54 = vstv %s191_s27  ;;  %v324_v19 = vadd.f32 %v320_v20, %v309_v6  ;;  %s183_s27 = smul.f32 0.5, %s1105_s4 }
  0x4c   :  { %v325_v30 = vadd.f32 %v321_v52, %v310_v7  ;;  %v391_v31 = vmul.f32 %v390_v44, %v956_v14  ;;  %v392_v32 = vmul.f32 %v390_v44, %v960_v21  ;;  %v386_v39 = vadd.f32 %v382_v34, %v377_v26  ;;  %s187_s0 = smul.f32 0.5, %s1124_s26 }
  0x4d   :  { %v387_v43 = vadd.f32 %v383_v36, %v378_v28  ;;  %v393_v46 = vmul.f32 %v390_v44, %v962_v25  ;;  %v394_v27 = vmul.f32 %v390_v44, %v966_v29  ;;  %v327_v47 = vadd.f32 %v326_v54, %v322_v45  ;;  %s207_s13 = smul.f32 0.5, %s1210_s3  ;;  %s1192_s3 = sld [smem:[#allocation7 + $0x3]] }
  0x4e   :  { %v388_v56 = vadd.f32 %v384_v50, %v379_v37  ;;  %v389_v59 = vadd.f32 %v385_v51, %v380_v38  ;;  %v426_v60 = vstv %s159_s28  ;;  %v1044_v52 = vadd.f32 %v326_v54, %v323_v53  ;;  %s185_s28 = smul.f32 0.5, %s1108_s22 }
  0x4f   :  { %v1046_v61 = vadd.f32 %v326_v54, %v324_v19  ;;  %v399_v62 = vstv %s157_s29  ;;  %v431_v63 = vstv %s161_s1  ;;  %v1051_v44 = vadd.f32 %v326_v54, %v325_v30  ;;  %s1136_s29 = sld [smem:[#allocation3 + $0x383]]  ;;  %s1150_s1 = sld [smem:[#allocation7]] }
  0x50   :  { %v395_v0 = vadd.f32 %v391_v31, %v386_v39  ;;  %v396_v45 = vadd.f32 %v392_v32, %v387_v43  ;;  %v427_v2 = vmul.f32 %v426_v60, %v863_v8  ;;  %711 = vtanh.f32 %v327_v47  ;;  %s203_s16 = smul.f32 0.25, %s1177_s9 }
  0x51   :  { %v397_v3 = vadd.f32 %v393_v46, %v388_v56  ;;  %v398_v6 = vadd.f32 %v394_v27, %v389_v59  ;;  %v428_v7 = vmul.f32 %v426_v60, %v865_v9  ;;  %v400_v18 = vmul.f32 %v399_v62, %v982_v55 }
  0x52   :  { %v429_v20 = vmul.f32 %v426_v60, %v867_v10  ;;  %v430_v26 = vmul.f32 %v426_v60, %v869_v11  ;;  %v432_v28 = vmul.f32 %v431_v63, %v871_v12  ;;  %v401_v34 = vmul.f32 %v399_v62, %v1004_v33 }
  0x53   :  { %v433_v36 = vmul.f32 %v431_v63, %v873_v13  ;;  %v434_v37 = vmul.f32 %v431_v63, %v877_v15  ;;  %v435_v38 = vmul.f32 %v431_v63, %v879_v16  ;;  %v402_v50 = vmul.f32 %v399_v62, %v1010_v48  ;;  %s205_s18 = smul.f32 0.25, %s1192_s3 }
  0x54   :  { %v436_v51 = vadd.f32 %v432_v28, %v427_v2  ;;  %v440_v53 = vstv %s163_s6  ;;  %v449_v54 = vstv %s165_s8  ;;  %v403_v19 = vmul.f32 %v399_v62, %v1012_v49  ;;  %s1168_s6 = sld [smem:[#allocation7 + $0x1]]  ;;  %s197_s8 = smul.f32 0.5, %s1145_s30 }
  0x55   :  { %v437_v30 = vadd.f32 %v433_v36, %v428_v7  ;;  %v438_v31 = vadd.f32 %v434_v37, %v429_v20  ;;  %v439_v32 = vadd.f32 %v435_v38, %v430_v26  ;;  %v408_v39 = vstv %s193_s10  ;;  %s189_s7 = smul.f32 0.5, %s1136_s29 }
  0x56   :  { %v441_v43 = vmul.f32 %v440_v53, %v881_v17  ;;  %v442_v46 = vmul.f32 %v440_v53, %v888_v22  ;;  %v443_v27 = vmul.f32 %v440_v53, %v890_v23  ;;  %v444_v47 = vmul.f32 %v440_v53, %v892_v24  ;;  %s199_s10 = smul.f32 0.25, %s1150_s1 }
  0x57   :  { %v450_v56 = vmul.f32 %v449_v54, %v908_v35  ;;  %v451_v59 = vmul.f32 %v449_v54, %v912_v40  ;;  %v452_v60 = vmul.f32 %v449_v54, %v914_v41  ;;  %v404_v62 = vadd.f32 %v400_v18, %v395_v0  ;;  %v1228_v18 = vld [vmem:[#allocation15_spill] sm:$0xff] }
  0x58   :  { %v445_v63 = vadd.f32 %v441_v43, %v436_v51  ;;  %v446_v2 = vadd.f32 %v442_v46, %v437_v30  ;;  %v447_v7 = vadd.f32 %v443_v27, %v438_v31  ;;  %v405_v20 = vadd.f32 %v401_v34, %v396_v45  ;;  %v1229_v30 = vld [vmem:[#allocation16_spill] sm:$0xff]  ;;  %v1230_v45 = vld [vmem:[#allocation17_spill] sm:$0xff]  ;;  %s208_s15 = sadd.f32 %s207_s13, %s199_s10 }
  0x59   :  { %v448_v26 = vadd.f32 %v444_v47, %v439_v32  ;;  %v453_v28 = vmul.f32 %v449_v54, %v916_v42  ;;  %v458_v36 = vstv %s167_s11  ;;  %v406_v37 = vadd.f32 %v402_v50, %v397_v3 }
  0x5a   :  { %v454_v38 = vadd.f32 %v450_v56, %v445_v63  ;;  %v455_v53 = vadd.f32 %v451_v59, %v446_v2  ;;  %v456_v35 = vadd.f32 %v452_v60, %v447_v7  ;;  %v1081_v24 = vpop.eup %711  ;;  %v407_v41 = vadd.f32 %v403_v19, %v398_v6 }
  0x5b   :  { %v457_v0 = vadd.f32 %v453_v28, %v448_v26  ;;  %v459_v51 = vmul.f32 %v458_v36, %v1228_v18  ;;  %v460_v31 = vmul.f32 %v458_v36, %v1229_v30  ;;  %v461_v34 = vmul.f32 %v458_v36, %v1230_v45 }
  0x5c   :  { %v462_v3 = vmul.f32 %v458_v36, %v933_v57  ;;  %v467_v50 = vstv %s169_s12  ;;  %v476_v54 = vstv %s171_s14  ;;  %713 = vtanh.f32 %v1044_v52  ;;  %s201_s14 = smul.f32 0.25, %s1168_s6 }
  0x5d   :  { %v463_v32 = vadd.f32 %v459_v51, %v454_v38  ;;  %v464_v43 = vadd.f32 %v460_v31, %v455_v53  ;;  %v468_v6 = vmul.f32 %v467_v50, %v935_v58  ;;  %v469_v19 = vmul.f32 %v467_v50, %v944_v1 }
  0x5e   :  { %v465_v46 = vadd.f32 %v461_v34, %v456_v35  ;;  %v466_v27 = vadd.f32 %v462_v3, %v457_v0  ;;  %v470_v47 = vmul.f32 %v467_v50, %v950_v4  ;;  %715 = vtanh.f32 %v1046_v61  ;;  %s209_s17 = sadd.f32 %s208_s15, %s201_s14 }
  0x5f   :  { %v409_v56 = vadd.f32 %v408_v39, %v404_v62  ;;  %v471_v59 = vmul.f32 %v467_v50, %v952_v5  ;;  %v472_v60 = vadd.f32 %v468_v6, %v463_v32  ;;  %717 = vtanh.f32 %v1051_v44 }
  0x60   :  { %v410_v63 = vadd.f32 %v408_v39, %v405_v20  ;;  %v477_v2 = vmul.f32 %v476_v54, %v956_v14  ;;  %v411_v35 = vadd.f32 %v408_v39, %v406_v37  ;;  %v412_v52 = vadd.f32 %v408_v39, %v407_v41 }
  0x61   :  { %v473_v61 = vadd.f32 %v469_v19, %v464_v43  ;;  %v478_v62 = vmul.f32 %v476_v54, %v960_v21  ;;  %v474_v7 = vadd.f32 %v470_v47, %v465_v46  ;;  %v475_v26 = vadd.f32 %v471_v59, %v466_v27 }
  0x62   :  { %v479_v28 = vmul.f32 %v476_v54, %v962_v25  ;;  %v480_v44 = vmul.f32 %v476_v54, %v966_v29  ;;  %719 = vtanh.f32 %v409_v56  ;;  %v481_v20 = vadd.f32 %v477_v2, %v472_v60 }
  0x63   :  { %v485_v36 = vstv %s173_s19  ;;  %721 = vtanh.f32 %v410_v63  ;;  %v482_v39 = vadd.f32 %v478_v62, %v473_v61  ;;  %v512_v38 = vstv %s175_s21  ;;  %s210_s19 = sadd.f32 %s209_s17, %s203_s16 }
  0x64   :  { %v486_v41 = vmul.f32 %v485_v36, %v982_v55  ;;  %723 = vtanh.f32 %v411_v35  ;;  %v487_v37 = vmul.f32 %v485_v36, %v1004_v33  ;;  %v483_v53 = vadd.f32 %v479_v28, %v474_v7 }
  0x65   :  { %725 = vtanh.f32 %v412_v52  ;;  %v484_v0 = vadd.f32 %v480_v44, %v475_v26  ;;  %v488_v51 = vmul.f32 %v485_v36, %v1010_v48  ;;  %v489_v31 = vmul.f32 %v485_v36, %v1012_v49  ;;  %s211_s20 = sadd.f32 %s210_s19, %s205_s18 }
  0x66   :  { %v490_v34 = vadd.f32 %v486_v41, %v481_v20  ;;  %v513_v3 = vmul.f32 %v512_v38, %v863_v8  ;;  %v514_v50 = vmul.f32 %v512_v38, %v865_v9  ;;  %v1121_v54 = vpop.eup %713  ;;  %v515_v32 = vmul.f32 %v512_v38, %v867_v10 }
  0x67   :  { %v516_v43 = vmul.f32 %v512_v38, %v869_v11  ;;  %v517_v6 = vstv %s177_s23  ;;  %v526_v19 = vstv %s179_s2  ;;  %v491_v27 = vadd.f32 %v487_v37, %v482_v39  ;;  %v1232_v37 = vld [vmem:[#allocation13_spill] sm:$0xff] }
  0x68   :  { %v1128_v46 = vpop.eup %715  ;;  %v494_v47 = vstv %s195_s24  ;;  %v518_v8 = vmul.f32 %v517_v6, %v871_v12  ;;  %v519_v9 = vmul.f32 %v517_v6, %v873_v13  ;;  %v492_v59 = vadd.f32 %v488_v51, %v483_v53 }
  0x69   :  { %v1133_v56 = vpop.eup %717  ;;  %v520_v10 = vmul.f32 %v517_v6, %v877_v15  ;;  %v521_v11 = vmul.f32 %v517_v6, %v879_v16  ;;  %v527_v60 = vmul.f32 %v526_v19, %v881_v17  ;;  %v493_v63 = vadd.f32 %v489_v31, %v484_v0  ;;  %v1231_v16 = vld [vmem:[#allocation12_spill] sm:$0xff]  ;;  %v1233_v0 = vld [vmem:[#allocation14_spill] sm:$0xff] }
  0x6a   :  { %v522_v2 = vadd.f32 %v518_v8, %v513_v3  ;;  %v523_v35 = vadd.f32 %v519_v9, %v514_v50  ;;  %v528_v12 = vmul.f32 %v526_v19, %v888_v22  ;;  %v495_v13 = vadd.f32 %v494_v47, %v490_v34 }
  0x6b   :  { %v524_v52 = vadd.f32 %v520_v10, %v515_v32  ;;  %v525_v61 = vadd.f32 %v521_v11, %v516_v43  ;;  %v529_v62 = vmul.f32 %v526_v19, %v890_v23  ;;  %v496_v15 = vadd.f32 %v494_v47, %v491_v27 }
  0x6c   :  { %v1143_v7 = vpop.eup %719  ;;  %v530_v17 = vmul.f32 %v526_v19, %v1231_v16  ;;  %v531_v26 = vadd.f32 %v527_v60, %v522_v2  ;;  %v532_v28 = vadd.f32 %v528_v12, %v523_v35  ;;  %v535_v20 = vstv %s181_s25 }
  0x6d   :  { %v1148_v44 = vpop.eup %721  ;;  %v533_v22 = vadd.f32 %v529_v62, %v524_v52  ;;  %v544_v36 = vstv %s183_s27  ;;  %v553_v23 = vstv %s185_s28  ;;  %v536_v38 = vmul.f32 %v535_v20, %v1232_v37 }
  0x6e   :  { %v1156_v41 = vpop.eup %723  ;;  %v534_v39 = vadd.f32 %v530_v17, %v525_v61  ;;  %v537_v53 = vmul.f32 %v535_v20, %v912_v40  ;;  %v538_v51 = vmul.f32 %v535_v20, %v1233_v0  ;;  %v539_v34 = vmul.f32 %v535_v20, %v916_v42 }
  0x6f   :  { %v1161_v31 = vpop.eup %725  ;;  %v545_v3 = vmul.f32 %v544_v36, %v1228_v18  ;;  %v546_v50 = vmul.f32 %v544_v36, %v1229_v30  ;;  %v547_v32 = vmul.f32 %v544_v36, %v1230_v45  ;;  %v540_v43 = vadd.f32 %v536_v38, %v531_v26 }
  0x70   :  { %v541_v6 = vadd.f32 %v537_v53, %v532_v28  ;;  %v542_v19 = vadd.f32 %v538_v51, %v533_v22  ;;  %v548_v40 = vmul.f32 %v544_v36, %v933_v57  ;;  %v543_v27 = vadd.f32 %v539_v34, %v534_v39 }
  0x71   :  { %v554_v8 = vmul.f32 %v553_v23, %v935_v58  ;;  %v555_v42 = vmul.f32 %v553_v23, %v944_v1  ;;  %v556_v18 = vmul.f32 %v553_v23, %v950_v4  ;;  %v549_v30 = vadd.f32 %v545_v3, %v540_v43 }
  0x72   :  { %v550_v9 = vadd.f32 %v546_v50, %v541_v6  ;;  %v551_v45 = vadd.f32 %v547_v32, %v542_v19  ;;  %v557_v10 = vmul.f32 %v553_v23, %v952_v5  ;;  %v497_v11 = vadd.f32 %v494_v47, %v492_v59 }
  0x73   :  { %v498_v60 = vadd.f32 %v494_v47, %v493_v63  ;;  %v552_v2 = vadd.f32 %v548_v40, %v543_v27  ;;  %v562_v35 = vstv %s187_s0  ;;  %727 = vtanh.f32 %v495_v13 }
  0x74   :  { %v558_v57 = vadd.f32 %v554_v8, %v549_v30  ;;  %v559_v58 = vadd.f32 %v555_v42, %v550_v9  ;;  %v560_v1 = vadd.f32 %v556_v18, %v551_v45  ;;  %v563_v4 = vmul.f32 %v562_v35, %v956_v14 }
  0x75   :  { %v561_v12 = vadd.f32 %v557_v10, %v552_v2  ;;  %v564_v52 = vmul.f32 %v562_v35, %v960_v21  ;;  %v571_v61 = vstv %s189_s7  ;;  %729 = vtanh.f32 %v496_v15 }
  0x76   :  { %v565_v5 = vmul.f32 %v562_v35, %v962_v25  ;;  %v566_v47 = vmul.f32 %v562_v35, %v966_v29  ;;  %731 = vtanh.f32 %v497_v11  ;;  %v567_v59 = vadd.f32 %v563_v4, %v558_v57 }
  0x77   :  { %v568_v63 = vadd.f32 %v564_v52, %v559_v58  ;;  %733 = vtanh.f32 %v498_v60  ;;  %v572_v21 = vmul.f32 %v571_v61, %v982_v55  ;;  %v573_v62 = vmul.f32 %v571_v61, %v1004_v33 }
  0x78   :  { %v569_v13 = vadd.f32 %v565_v5, %v560_v1  ;;  %v570_v14 = vadd.f32 %v566_v47, %v561_v12  ;;  %v574_v16 = vmul.f32 %v571_v61, %v1010_v48  ;;  %v575_v15 = vmul.f32 %v571_v61, %v1012_v49 }
  0x79   :  { %v580_v17 = vstv %s197_s8  ;;  %v576_v25 = vadd.f32 %v572_v21, %v567_v59  ;;  %v577_v29 = vadd.f32 %v573_v62, %v568_v63  ;;  %v335_v22 = vstv %s199_s10 }
  0x7a   :  { %v578_v26 = vadd.f32 %v574_v16, %v569_v13  ;;  %v579_v28 = vadd.f32 %v575_v15, %v570_v14  ;;  %v417_v20 = vstv %s201_s14  ;;  %v336_v48 = vmul.f32 %v1081_v24, %v335_v22 }
  0x7b   :  { %v581_v36 = vadd.f32 %v580_v17, %v576_v25  ;;  %v582_v23 = vadd.f32 %v580_v17, %v577_v29  ;;  %v418_v49 = vmul.f32 %v1143_v7, %v417_v20  ;;  %v337_v38 = vmul.f32 %v1121_v54, %v335_v22 }
  0x7c   :  { %v583_v55 = vadd.f32 %v580_v17, %v578_v26  ;;  %v584_v39 = vadd.f32 %v580_v17, %v579_v28  ;;  %v419_v53 = vmul.f32 %v1148_v44, %v417_v20  ;;  %v503_v0 = vstv %s203_s16 }
  0x7d   :  { %v728_v33 = vpop.eup %727  ;;  %735 = vtanh.f32 %v581_v36  ;;  %v338_v34 = vmul.f32 %v1128_v46, %v335_v22  ;;  %v420_v3 = vmul.f32 %v1156_v41, %v417_v20  ;;  %v339_v24 = vmul.f32 %v1133_v56, %v335_v22 }
  0x7e   :  { %737 = vtanh.f32 %v582_v23  ;;  %v421_v7 = vmul.f32 %v1161_v31, %v417_v20  ;;  %v422_v32 = vadd.f32 %v418_v49, %v336_v48  ;;  %v504_v43 = vmul.f32 %v728_v33, %v503_v0 }
  0x7f   :  { %v730_v37 = vpop.eup %729  ;;  %739 = vtanh.f32 %v583_v55  ;;  %v423_v54 = vadd.f32 %v419_v53, %v337_v38  ;;  %v424_v44 = vadd.f32 %v420_v3, %v338_v34  ;;  %v589_v46 = vstv %s205_s18 }
  0x80   :  { %v732_v51 = vpop.eup %731  ;;  %741 = vtanh.f32 %v584_v39  ;;  %v505_v6 = vmul.f32 %v730_v37, %v503_v0  ;;  %v425_v40 = vadd.f32 %v421_v7, %v339_v24  ;;  %v508_v8 = vadd.f32 %v504_v43, %v422_v32 }
  0x81   :  { %v734_v50 = vpop.eup %733  ;;  %v506_v19 = vmul.f32 %v732_v51, %v503_v0  ;;  %v598_v31 = vstv %s211_s20 }
  0x82   :  { %v507_v27 = vmul.f32 %v734_v50, %v503_v0  ;;  %v509_v42 = vadd.f32 %v505_v6, %v423_v54 }
  0x83   :  { %v510_v30 = vadd.f32 %v506_v19, %v424_v44 }
  0x84   :  { %v511_v56 = vadd.f32 %v507_v27, %v425_v40 }
  0x87   :  { %v736_v41 = vpop.eup %735 }
  0x88   :  { %v738_v18 = vpop.eup %737  ;;  %v590_v9 = vmul.f32 %v736_v41, %v589_v46 }
  0x89   :  { %v740_v45 = vpop.eup %739  ;;  %v591_v10 = vmul.f32 %v738_v18, %v589_v46 }
  0x8a   :  { %v742_v11 = vpop.eup %741  ;;  %v592_v60 = vmul.f32 %v740_v45, %v589_v46  ;;  %v594_v2 = vadd.f32 %v590_v9, %v508_v8 }
  0x8b   :  { %v593_v35 = vmul.f32 %v742_v11, %v589_v46  ;;  %v595_v57 = vadd.f32 %v591_v10, %v509_v42 }
  0x8c   :  { %v596_v58 = vadd.f32 %v592_v60, %v510_v30  ;;  %v599_v1 = vadd.f32 %v598_v31, %v594_v2 }
  0x8d   :  { %v597_v12 = vadd.f32 %v593_v35, %v511_v56  ;;  %v600_v4 = vadd.f32 %v598_v31, %v595_v57 }
  0x8e   :  { %v601_v52 = vadd.f32 %v598_v31, %v596_v58  ;;  %743 = vtanh.f32 %v599_v1 }
  0x8f   :  { %v602_v61 = vadd.f32 %v598_v31, %v597_v12  ;;  %745 = vtanh.f32 %v600_v4 }
  0x90   :  { %747 = vtanh.f32 %v601_v52 }
  0x91   :  { %749 = vtanh.f32 %v602_v61 }
  0x98   :  { %v744_v5 = vpop.eup %743 }
  0x99   :  { %v746_v47 = vpop.eup %745  ;;  %v607_v59 = vmul.f32 0.5, %v744_v5 }
  0x9a   :  { %v748_v63 = vpop.eup %747 }
  0x9b   :  { %v750_v13 = vpop.eup %749  ;;  %v611_v14 = vadd.f32 0.5, %v607_v59 }
  0x9d   :  { %615 = vst [vmem:[#allocation9] sm:$0xff] %v611_v14 }
  0xa4   :  { %v636_v21 = vld [vmem:[#allocation9] sm:$0x1] }
  0xa5   :  { %637 = vst [vmem:[%s1212_s5] sm:$0x1] %v636_v21 }
  0xa6   :  { %654 = vsyncpa [#allocation4], 1 }
  0xa7   :  { %655 = vsyncpa [#allocation6], 1 }

</bundles_post_ra>
